<compile_context>
chip_gen: v5e
topology: v5e:2x2
jax: 0.10.0
libtpu: 0.0.40
codegen_flags: <defaults>
</compile_context>

<pallas_src>
import functools
import math

import jax
import jax.numpy as jnp
from jax.experimental import pallas as pl
from jax.experimental.pallas import tpu as pltpu

HIDDEN = 128
IN_DIM = 2
OUT_DIM = 2


def _round_up(n, m):
    return ((n + m - 1) // m) * m


def _softplus(x):
    # Numerically stable softplus (matches F.softplus; exp underflow for large
    # |x| gives the linear branch automatically, also in bf16).
    return jnp.maximum(x, 0.0) + jnp.log1p(jnp.exp(-jnp.abs(x)))


def _default_elementwise_bf16():
    """bf16 VPU/EUP exists on v6e/v7x; v5e and older would emulate -> keep f32."""
    try:
        kind = jax.devices()[0].device_kind.lower()
        return not any(tag in kind for tag in ("v2", "v3", "v4", "v5"))
    except Exception:  # pragma: no cover - conservative fallback
        return True


def conditional_model_kernel(
    x_ref, y_ref, emb_ref,
    w1_ref, b1_ref, w2_ref, b2_ref,
    w3_ref, b3_ref, w4_ref, b4_ref,
    out_ref, *, ew_dtype,
):
    tile_b = x_ref.shape[0]
    n_steps = emb_ref.shape[0]

    # ---- In-kernel embedding gather: one_hot(y) @ emb_cat (K = n_steps). ----
    # One-hot values {0,1} are exact in emb_ref.dtype (bf16 or f32); out-of-
    # range y yields all-zero gates (PyTorch would raise — valid inputs only).
    y = y_ref[...]                                               # (TILE_B, 1) i32
    step_ids = jax.lax.broadcasted_iota(jnp.int32, (tile_b, n_steps), 1)
    onehot = (step_ids == y).astype(emb_ref.dtype)               # (TILE_B, n_steps)
    gates = jnp.dot(onehot, emb_ref[...],
                    preferred_element_type=jnp.float32)          # (TILE_B, 3*HIDDEN)
    g1 = gates[:, 0 * HIDDEN:1 * HIDDEN].astype(ew_dtype)
    g2 = gates[:, 1 * HIDDEN:2 * HIDDEN].astype(ew_dtype)
    g3 = gates[:, 2 * HIDDEN:3 * HIDDEN].astype(ew_dtype)

    # ---- Layer 1: K=2 -> two broadcasted VPU FMAs, not an MXU pass. ---------
    x = x_ref[...]                                               # (TILE_B, 2) f32
    w1 = w1_ref[...]                                             # (2, HIDDEN) f32
    pre1 = x[:, 0:1] * w1[0:1, :] + x[:, 1:2] * w1[1:2, :] + b1_ref[...]
    h = _softplus(g1 * pre1.astype(ew_dtype))

    # ---- Layers 2/3: MXU matmuls with f32 accumulation; bias/gate/softplus
    #      in ew_dtype (bf16 on v6e/v7x, f32 on v5e). --------------------------
    mx = w2_ref.dtype
    pre2 = jnp.dot(h.astype(mx), w2_ref[...],
                   preferred_element_type=jnp.float32)
    h = _softplus(g2 * (pre2.astype(ew_dtype) + b2_ref[...].astype(ew_dtype)))

    pre3 = jnp.dot(h.astype(mx), w3_ref[...],
                   preferred_element_type=jnp.float32)
    h = _softplus(g3 * (pre3.astype(ew_dtype) + b3_ref[...].astype(ew_dtype)))

    # ---- Output layer (plain linear, N=2), f32 bias add + store. ------------
    # TODO(synk): output last dim = 2 is lane-sparse (masked vst); pack to a
    # lane-dense slab if this ever dominates the store slot (negligible here).
    out = jnp.dot(h.astype(w4_ref.dtype), w4_ref[...],
                  preferred_element_type=jnp.float32) + b4_ref[...]
    out_ref[...] = out.astype(out_ref.dtype)


def init_params(key, n_steps):
    """Deterministic init mimicking the PyTorch module's __init__ shapes.

    nn.Linear(in, out): W (out,in) uniform(+-1/sqrt(in)) — stored transposed here.
    nn.Embedding(n_steps, out).weight.uniform_(): uniform [0,1).
    """
    ks = jax.random.split(key, 12)

    def linear(kw, kb, fan_in, fan_out):
        bound = 1.0 / math.sqrt(fan_in)
        w = jax.random.uniform(kw, (fan_in, fan_out), jnp.float32, -bound, bound)
        b = jax.random.uniform(kb, (1, fan_out), jnp.float32, -bound, bound)
        return w, b

    w1, b1 = linear(ks[0], ks[1], IN_DIM, HIDDEN)
    w2, b2 = linear(ks[2], ks[3], HIDDEN, HIDDEN)
    w3, b3 = linear(ks[4], ks[5], HIDDEN, HIDDEN)
    w4, b4 = linear(ks[6], ks[7], HIDDEN, OUT_DIM)

    emb1 = jax.random.uniform(ks[8], (n_steps, HIDDEN), jnp.float32)
    emb2 = jax.random.uniform(ks[9], (n_steps, HIDDEN), jnp.float32)
    emb3 = jax.random.uniform(ks[10], (n_steps, HIDDEN), jnp.float32)

    return dict(w1=w1, b1=b1, w2=w2, b2=b2, w3=w3, b3=b3, w4=w4, b4=b4,
                emb1=emb1, emb2=emb2, emb3=emb3)


def prepare_params(params, *, use_bf16=True):
    """One-time param prep: concat the embedding tables and cast MXU operands.

    Hoisted out of the per-call wrapper so the casts/concat are not re-emitted
    as small XLA ops in front of every pallas_call.
    """
    mx = jnp.bfloat16 if use_bf16 else jnp.float32
    emb_cat = jnp.concatenate(
        [params["emb1"], params["emb2"], params["emb3"]], axis=1)  # (n_steps, 384)
    return dict(
        emb_cat=emb_cat.astype(mx),
        w1=params["w1"], b1=params["b1"],
        w2=params["w2"].astype(mx), b2=params["b2"],
        w3=params["w3"].astype(mx), b3=params["b3"],
        w4=params["w4"].astype(mx), b4=params["b4"],
    )


def _choose_tile_b(B):
    """Large tiles to amortize per-step overhead, but >=2 grid steps for big
    batches so v7x's two TensorCores both get work."""
    b8 = _round_up(max(B, 8), 8)
    if b8 <= 512:
        return b8
    n_tiles = max(2, pl.cdiv(b8, 2048))
    return _round_up(pl.cdiv(b8, n_tiles), 8)


def conditional_model_forward(prepped, x, y, *, elementwise_bf16=None, tile_b=None):
    """x: (B, 2) float32, y: (B,) int32 timestep indices.  `prepped` comes from
    prepare_params()."""
    B = x.shape[0]
    n_steps = prepped["emb_cat"].shape[0]

    if elementwise_bf16 is None:
        elementwise_bf16 = _default_elementwise_bf16()
    # Only use bf16 elementwise when the MXU operands are bf16 too.
    if prepped["w2"].dtype != jnp.bfloat16:
        elementwise_bf16 = False
    ew_dtype = jnp.bfloat16 if elementwise_bf16 else jnp.float32

    if tile_b is None:
        tile_b = _choose_tile_b(B)
    tile_b = _round_up(max(tile_b, 8), 8)
    B_pad = _round_up(B, tile_b)

    if B_pad != B:
        x = jnp.pad(x, ((0, B_pad - B), (0, 0)))
        y = jnp.pad(y, ((0, B_pad - B),))          # pads with index 0 (valid)
    y2d = y.reshape(B_pad, 1).astype(jnp.int32)

    operands = (
        x, y2d, prepped["emb_cat"],
        prepped["w1"], prepped["b1"],
        prepped["w2"], prepped["b2"],
        prepped["w3"], prepped["b3"],
        prepped["w4"], prepped["b4"],
    )

    grid = (B_pad // tile_b,)

    def tiled(shape):
        nd = len(shape)
        return pl.BlockSpec((tile_b,) + tuple(shape[1:]),
                            lambda i, _nd=nd: (i,) + (0,) * (_nd - 1))

    def resident(shape):
        nd = len(shape)
        return pl.BlockSpec(tuple(shape), lambda i, _nd=nd: (0,) * _nd)

    in_specs = [
        tiled(x.shape),                     # x      (pipelined per batch tile)
        tiled(y2d.shape),                   # y      (pipelined per batch tile)
        resident(prepped["emb_cat"].shape),  # embeddings (DMA'd once, resident)
        resident(prepped["w1"].shape), resident(prepped["b1"].shape),
        resident(prepped["w2"].shape), resident(prepped["b2"].shape),
        resident(prepped["w3"].shape), resident(prepped["b3"].shape),
        resident(prepped["w4"].shape), resident(prepped["b4"].shape),
    ]

    flops = 2 * B_pad * (n_steps * 3 * HIDDEN        # in-kernel gather matmul
                         + IN_DIM * HIDDEN           # layer 1 (VPU FMAs)
                         + 2 * HIDDEN * HIDDEN       # layers 2, 3
                         + HIDDEN * OUT_DIM)         # layer 4
    transcendentals = B_pad * HIDDEN * 3 * 2         # exp + log1p per layer
    bytes_accessed = (sum(int(op.size) * op.dtype.itemsize for op in operands)
                      + B_pad * OUT_DIM * 4)

    kernel = functools.partial(conditional_model_kernel, ew_dtype=ew_dtype)

    out = pl.pallas_call(
        kernel,
        out_shape=jax.ShapeDtypeStruct((B_pad, OUT_DIM), jnp.float32),
        grid=grid,
        in_specs=in_specs,
        out_specs=tiled((B_pad, OUT_DIM)),
        compiler_params=pltpu.CompilerParams(
            dimension_semantics=("parallel",),       # v7x: shard tiles across 2 TCs
            vmem_limit_bytes=64 << 20,
        ),
        cost_estimate=pl.CostEstimate(
            flops=flops,
            transcendentals=transcendentals,
            bytes_accessed=bytes_accessed),
    )(*operands)

    return out[:B]


def reference_forward(params, x, y):
    g1 = jnp.take(params["emb1"], y, axis=0)
    g2 = jnp.take(params["emb2"], y, axis=0)
    g3 = jnp.take(params["emb3"], y, axis=0)
    sp = lambda v: jnp.maximum(v, 0.0) + jnp.log1p(jnp.exp(-jnp.abs(v)))
    h = sp(g1 * (x @ params["w1"] + params["b1"]))
    h = sp(g2 * (h @ params["w2"] + params["b2"]))
    h = sp(g3 * (h @ params["w3"] + params["b3"]))
    return h @ params["w4"] + params["b4"]


if __name__ == "__main__":
    key = jax.random.PRNGKey(0)
    k_param, k_x, k_y = jax.random.split(key, 3)

    n_steps = 10
    B = 8  # small batch (sublane-aligned)

    params = init_params(k_param, n_steps)
    x = jax.random.normal(k_x, (B, IN_DIM), jnp.float32)
    y = jax.random.randint(k_y, (B,), 0, n_steps, jnp.int32)

    ref = reference_forward(params, x, y)

    # Exact f32 path: tight check against the pure-JAX reference.
    prepped_f32 = prepare_params(params, use_bf16=False)
    out_f32 = jax.block_until_ready(
        conditional_model_forward(prepped_f32, x, y, elementwise_bf16=False))
    assert out_f32.shape == (B, OUT_DIM)
    assert jnp.allclose(out_f32, ref, atol=1e-5, rtol=1e-5), "f32 mismatch vs reference"

    # Fast path: bf16 MXU operands + (on v6e/v7x) bf16 elementwise chain.
    # Accumulation stays f32; looser tolerance covers bf16 rounding only.
    prepped_bf16 = prepare_params(params, use_bf16=True)
    out_bf16 = jax.block_until_ready(
        conditional_model_forward(prepped_bf16, x, y))
    assert out_bf16.shape == (B, OUT_DIM)
    assert jnp.allclose(out_bf16, ref, atol=5e-2, rtol=5e-2), "bf16 mismatch vs reference"

    print("KERNEL_OK")
</pallas_src>

<mosaic_0001>
module attributes {stable_mosaic.version = 11 : i64} {
  func.func @conditional_model_kernel(%arg0: i32, %arg1: memref<8x2xf32, #tpu.memory_space<vmem>>, %arg2: memref<8x1xi32, #tpu.memory_space<vmem>>, %arg3: memref<10x384xf32, #tpu.memory_space<vmem>>, %arg4: memref<2x128xf32, #tpu.memory_space<vmem>>, %arg5: memref<1x128xf32, #tpu.memory_space<vmem>>, %arg6: memref<128x128xf32, #tpu.memory_space<vmem>>, %arg7: memref<1x128xf32, #tpu.memory_space<vmem>>, %arg8: memref<128x128xf32, #tpu.memory_space<vmem>>, %arg9: memref<1x128xf32, #tpu.memory_space<vmem>>, %arg10: memref<128x2xf32, #tpu.memory_space<vmem>>, %arg11: memref<1x2xf32, #tpu.memory_space<vmem>>, %arg12: memref<8x2xf32, #tpu.memory_space<vmem>>) attributes {dimension_semantics = [#tpu.dimension_semantics<parallel>], iteration_bounds = array<i64: 1>, scalar_prefetch = 0 : i64, scratch_operands = 0 : i64, tpu.core_type = #tpu.core_type<tc>, window_params = [{transform_indices = @transform_0, window_bounds = array<i64: 8, 2>}, {transform_indices = @transform_1, window_bounds = array<i64: 8, 1>}, {pipeline_mode = #tpu.pipeline_mode<synchronous>, transform_indices = @transform_2, window_bounds = array<i64: 10, 384>}, {pipeline_mode = #tpu.pipeline_mode<synchronous>, transform_indices = @transform_3, window_bounds = array<i64: 2, 128>}, {pipeline_mode = #tpu.pipeline_mode<synchronous>, transform_indices = @transform_4, window_bounds = array<i64: 1, 128>}, {pipeline_mode = #tpu.pipeline_mode<synchronous>, transform_indices = @transform_5, window_bounds = array<i64: 128, 128>}, {pipeline_mode = #tpu.pipeline_mode<synchronous>, transform_indices = @transform_6, window_bounds = array<i64: 1, 128>}, {pipeline_mode = #tpu.pipeline_mode<synchronous>, transform_indices = @transform_7, window_bounds = array<i64: 128, 128>}, {pipeline_mode = #tpu.pipeline_mode<synchronous>, transform_indices = @transform_8, window_bounds = array<i64: 1, 128>}, {pipeline_mode = #tpu.pipeline_mode<synchronous>, transform_indices = @transform_9, window_bounds = array<i64: 128, 2>}, {pipeline_mode = #tpu.pipeline_mode<synchronous>, transform_indices = @transform_10, window_bounds = array<i64: 1, 2>}, {transform_indices = @transform_11, window_bounds = array<i64: 8, 2>}]} {
    %c0 = arith.constant 0 : index
    %c0_0 = arith.constant 0 : index
    %0 = vector.load %arg2[%c0, %c0_0] : memref<8x1xi32, #tpu.memory_space<vmem>>, vector<8x1xi32>
    %1 = tpu.iota {dimensions = array<i32: 1>} : vector<8x10xi32>
    %2 = vector.broadcast %0 : vector<8x1xi32> to vector<8x10xi32>
    %3 = arith.cmpi eq, %1, %2 : vector<8x10xi32>
    %4 = arith.extui %3 : vector<8x10xi1> to vector<8x10xi32>
    %5 = arith.sitofp %4 : vector<8x10xi32> to vector<8x10xf32>
    %c0_1 = arith.constant 0 : index
    %c0_2 = arith.constant 0 : index
    %6 = vector.load %arg3[%c0_1, %c0_2] : memref<10x384xf32, #tpu.memory_space<vmem>>, vector<10x384xf32>
    %cst = arith.constant dense<0.000000e+00> : vector<8x384xf32>
    %7 = tpu.matmul %5, %6, %cst {dimension_numbers = #tpu.dot_dimension_numbers<[1], [0], [0], [1], [0, 0, 1, 1], [], []>} : vector<8x10xf32>, vector<10x384xf32>, vector<8x384xf32> -> vector<8x384xf32>
    %8 = vector.extract_strided_slice %7 {offsets = [0, 0], sizes = [8, 128], strides = [1, 1]} : vector<8x384xf32> to vector<8x128xf32>
    %9 = vector.extract_strided_slice %7 {offsets = [0, 128], sizes = [8, 128], strides = [1, 1]} : vector<8x384xf32> to vector<8x128xf32>
    %10 = vector.extract_strided_slice %7 {offsets = [0, 256], sizes = [8, 128], strides = [1, 1]} : vector<8x384xf32> to vector<8x128xf32>
    %c0_3 = arith.constant 0 : index
    %c0_4 = arith.constant 0 : index
    %11 = vector.load %arg1[%c0_3, %c0_4] : memref<8x2xf32, #tpu.memory_space<vmem>>, vector<8x2xf32>
    %c0_5 = arith.constant 0 : index
    %c0_6 = arith.constant 0 : index
    %12 = vector.load %arg4[%c0_5, %c0_6] : memref<2x128xf32, #tpu.memory_space<vmem>>, vector<2x128xf32>
    %13 = vector.extract_strided_slice %11 {offsets = [0, 0], sizes = [8, 1], strides = [1, 1]} : vector<8x2xf32> to vector<8x1xf32>
    %14 = vector.extract_strided_slice %12 {offsets = [0, 0], sizes = [1, 128], strides = [1, 1]} : vector<2x128xf32> to vector<1x128xf32>
    %15 = vector.broadcast %13 : vector<8x1xf32> to vector<8x128xf32>
    %16 = vector.broadcast %14 : vector<1x128xf32> to vector<8x128xf32>
    %17 = arith.mulf %15, %16 : vector<8x128xf32>
    %18 = vector.extract_strided_slice %11 {offsets = [0, 1], sizes = [8, 1], strides = [1, 1]} : vector<8x2xf32> to vector<8x1xf32>
    %19 = vector.extract_strided_slice %12 {offsets = [1, 0], sizes = [1, 128], strides = [1, 1]} : vector<2x128xf32> to vector<1x128xf32>
    %20 = vector.broadcast %18 : vector<8x1xf32> to vector<8x128xf32>
    %21 = vector.broadcast %19 : vector<1x128xf32> to vector<8x128xf32>
    %22 = arith.mulf %20, %21 : vector<8x128xf32>
    %23 = arith.addf %17, %22 : vector<8x128xf32>
    %c0_7 = arith.constant 0 : index
    %c0_8 = arith.constant 0 : index
    %24 = vector.load %arg5[%c0_7, %c0_8] : memref<1x128xf32, #tpu.memory_space<vmem>>, vector<1x128xf32>
    %25 = vector.broadcast %24 : vector<1x128xf32> to vector<8x128xf32>
    %26 = arith.addf %23, %25 : vector<8x128xf32>
    %27 = arith.mulf %8, %26 : vector<8x128xf32>
    %cst_9 = arith.constant 0.000000e+00 : f32
    %28 = vector.broadcast %cst_9 : f32 to vector<8x128xf32>
    %29 = arith.maximumf %27, %28 : vector<8x128xf32>
    %30 = math.absf %27 : vector<8x128xf32>
    %cst_10 = arith.constant 0.000000e+00 : f32
    %31 = vector.broadcast %cst_10 : f32 to vector<8x128xf32>
    %32 = arith.subf %31, %30 : vector<8x128xf32>
    %33 = math.exp %32 : vector<8x128xf32>
    %34 = math.log1p %33 : vector<8x128xf32>
    %35 = arith.addf %29, %34 : vector<8x128xf32>
    %c0_11 = arith.constant 0 : index
    %c0_12 = arith.constant 0 : index
    %36 = vector.load %arg6[%c0_11, %c0_12] : memref<128x128xf32, #tpu.memory_space<vmem>>, vector<128x128xf32>
    %cst_13 = arith.constant dense<0.000000e+00> : vector<8x128xf32>
    %37 = tpu.matmul %35, %36, %cst_13 {dimension_numbers = #tpu.dot_dimension_numbers<[1], [0], [0], [1], [0, 0, 1, 1], [], []>} : vector<8x128xf32>, vector<128x128xf32>, vector<8x128xf32> -> vector<8x128xf32>
    %c0_14 = arith.constant 0 : index
    %c0_15 = arith.constant 0 : index
    %38 = vector.load %arg7[%c0_14, %c0_15] : memref<1x128xf32, #tpu.memory_space<vmem>>, vector<1x128xf32>
    %39 = vector.broadcast %38 : vector<1x128xf32> to vector<8x128xf32>
    %40 = arith.addf %37, %39 : vector<8x128xf32>
    %41 = arith.mulf %9, %40 : vector<8x128xf32>
    %cst_16 = arith.constant 0.000000e+00 : f32
    %42 = vector.broadcast %cst_16 : f32 to vector<8x128xf32>
    %43 = arith.maximumf %41, %42 : vector<8x128xf32>
    %44 = math.absf %41 : vector<8x128xf32>
    %cst_17 = arith.constant 0.000000e+00 : f32
    %45 = vector.broadcast %cst_17 : f32 to vector<8x128xf32>
    %46 = arith.subf %45, %44 : vector<8x128xf32>
    %47 = math.exp %46 : vector<8x128xf32>
    %48 = math.log1p %47 : vector<8x128xf32>
    %49 = arith.addf %43, %48 : vector<8x128xf32>
    %c0_18 = arith.constant 0 : index
    %c0_19 = arith.constant 0 : index
    %50 = vector.load %arg8[%c0_18, %c0_19] : memref<128x128xf32, #tpu.memory_space<vmem>>, vector<128x128xf32>
    %cst_20 = arith.constant dense<0.000000e+00> : vector<8x128xf32>
    %51 = tpu.matmul %49, %50, %cst_20 {dimension_numbers = #tpu.dot_dimension_numbers<[1], [0], [0], [1], [0, 0, 1, 1], [], []>} : vector<8x128xf32>, vector<128x128xf32>, vector<8x128xf32> -> vector<8x128xf32>
    %c0_21 = arith.constant 0 : index
    %c0_22 = arith.constant 0 : index
    %52 = vector.load %arg9[%c0_21, %c0_22] : memref<1x128xf32, #tpu.memory_space<vmem>>, vector<1x128xf32>
    %53 = vector.broadcast %52 : vector<1x128xf32> to vector<8x128xf32>
    %54 = arith.addf %51, %53 : vector<8x128xf32>
    %55 = arith.mulf %10, %54 : vector<8x128xf32>
    %cst_23 = arith.constant 0.000000e+00 : f32
    %56 = vector.broadcast %cst_23 : f32 to vector<8x128xf32>
    %57 = arith.maximumf %55, %56 : vector<8x128xf32>
    %58 = math.absf %55 : vector<8x128xf32>
    %cst_24 = arith.constant 0.000000e+00 : f32
    %59 = vector.broadcast %cst_24 : f32 to vector<8x128xf32>
    %60 = arith.subf %59, %58 : vector<8x128xf32>
    %61 = math.exp %60 : vector<8x128xf32>
    %62 = math.log1p %61 : vector<8x128xf32>
    %63 = arith.addf %57, %62 : vector<8x128xf32>
    %c0_25 = arith.constant 0 : index
    %c0_26 = arith.constant 0 : index
    %64 = vector.load %arg10[%c0_25, %c0_26] : memref<128x2xf32, #tpu.memory_space<vmem>>, vector<128x2xf32>
    %cst_27 = arith.constant dense<0.000000e+00> : vector<8x2xf32>
    %65 = tpu.matmul %63, %64, %cst_27 {dimension_numbers = #tpu.dot_dimension_numbers<[1], [0], [0], [1], [0, 0, 1, 1], [], []>} : vector<8x128xf32>, vector<128x2xf32>, vector<8x2xf32> -> vector<8x2xf32>
    %c0_28 = arith.constant 0 : index
    %c0_29 = arith.constant 0 : index
    %66 = vector.load %arg11[%c0_28, %c0_29] : memref<1x2xf32, #tpu.memory_space<vmem>>, vector<1x2xf32>
    %67 = vector.broadcast %66 : vector<1x2xf32> to vector<8x2xf32>
    %68 = arith.addf %65, %67 : vector<8x2xf32>
    %c0_30 = arith.constant 0 : index
    %c0_31 = arith.constant 0 : index
    %69 = vector.load %arg12[%c0_30, %c0_31] : memref<8x2xf32, #tpu.memory_space<vmem>>, vector<8x2xf32>
    tpu.vector_store %arg12[%c0_30, %c0_31], %68 {strides = array<i32>} : memref<8x2xf32, #tpu.memory_space<vmem>>, vector<8x2xf32>,
    return
  }
  func.func @transform_0(%arg0: i32) -> (i32, i32) {
    %c0_i32 = arith.constant 0 : i32
    %c0_i32_0 = arith.constant 0 : i32
    return %arg0, %c0_i32 : i32, i32
  }
  func.func @transform_1(%arg0: i32) -> (i32, i32) {
    %c0_i32 = arith.constant 0 : i32
    %c0_i32_0 = arith.constant 0 : i32
    return %arg0, %c0_i32 : i32, i32
  }
  func.func @transform_2(%arg0: i32) -> (i32, i32) {
    %c0_i32 = arith.constant 0 : i32
    %c0_i32_0 = arith.constant 0 : i32
    %c0_i32_1 = arith.constant 0 : i32
    return %c0_i32, %c0_i32_0 : i32, i32
  }
  func.func @transform_3(%arg0: i32) -> (i32, i32) {
    %c0_i32 = arith.constant 0 : i32
    %c0_i32_0 = arith.constant 0 : i32
    %c0_i32_1 = arith.constant 0 : i32
    return %c0_i32, %c0_i32_0 : i32, i32
  }
  func.func @transform_4(%arg0: i32) -> (i32, i32) {
    %c0_i32 = arith.constant 0 : i32
    %c0_i32_0 = arith.constant 0 : i32
    %c0_i32_1 = arith.constant 0 : i32
    return %c0_i32, %c0_i32_0 : i32, i32
  }
  func.func @transform_5(%arg0: i32) -> (i32, i32) {
    %c0_i32 = arith.constant 0 : i32
    %c0_i32_0 = arith.constant 0 : i32
    %c0_i32_1 = arith.constant 0 : i32
    return %c0_i32, %c0_i32_0 : i32, i32
  }
  func.func @transform_6(%arg0: i32) -> (i32, i32) {
    %c0_i32 = arith.constant 0 : i32
    %c0_i32_0 = arith.constant 0 : i32
    %c0_i32_1 = arith.constant 0 : i32
    return %c0_i32, %c0_i32_0 : i32, i32
  }
  func.func @transform_7(%arg0: i32) -> (i32, i32) {
    %c0_i32 = arith.constant 0 : i32
    %c0_i32_0 = arith.constant 0 : i32
    %c0_i32_1 = arith.constant 0 : i32
    return %c0_i32, %c0_i32_0 : i32, i32
  }
  func.func @transform_8(%arg0: i32) -> (i32, i32) {
    %c0_i32 = arith.constant 0 : i32
    %c0_i32_0 = arith.constant 0 : i32
    %c0_i32_1 = arith.constant 0 : i32
    return %c0_i32, %c0_i32_0 : i32, i32
  }
  func.func @transform_9(%arg0: i32) -> (i32, i32) {
    %c0_i32 = arith.constant 0 : i32
    %c0_i32_0 = arith.constant 0 : i32
    %c0_i32_1 = arith.constant 0 : i32
    return %c0_i32, %c0_i32_0 : i32, i32
  }
  func.func @transform_10(%arg0: i32) -> (i32, i32) {
    %c0_i32 = arith.constant 0 : i32
    %c0_i32_0 = arith.constant 0 : i32
    %c0_i32_1 = arith.constant 0 : i32
    return %c0_i32, %c0_i32_0 : i32, i32
  }
  func.func @transform_11(%arg0: i32) -> (i32, i32) {
    %c0_i32 = arith.constant 0 : i32
    %c0_i32_0 = arith.constant 0 : i32
    return %arg0, %c0_i32 : i32, i32
  }
}

</mosaic_0001>

<bundles_post_ra>
// kernel: tpu_custom_call.1
= control target key start
LH: loop header
LB: loop body
LE: loop exit
PB: predicated region body
PF: predicated region fallthrough
CT: control target
= control target key end

     0   :  { %16 = vsyncpa [#allocation3], 0  ;;  %s641_s0 = inlined_call_operand.vmem [shape: f32[8,2], index: 0, kind: input, shape index: {}]   ;;  %s642_s1 = inlined_call_operand.vmem [shape: s32[8,1], index: 1, kind: input, shape index: {}]   ;;  %s643_s2 = inlined_call_operand.hbm [shape: f32[10,384], index: 2, kind: input, shape index: {}]   ;;  %s644_s3 = inlined_call_operand.vmem [shape: f32[2,128], index: 3, kind: input, shape index: {}]   ;;  %s645_s4 = inlined_call_operand.vmem [shape: f32[1,128], index: 4, kind: input, shape index: {}]   ;;  %s646_s5 = inlined_call_operand.vmem [shape: f32[128,128], index: 5, kind: input, shape index: {}]   ;;  %s647_s6 = inlined_call_operand.vmem [shape: f32[1,128], index: 6, kind: input, shape index: {}]   ;;  %s648_s7 = inlined_call_operand.hbm [shape: f32[128,128], index: 7, kind: input, shape index: {}]   ;;  %s649_s8 = inlined_call_operand.vmem [shape: f32[1,128], index: 8, kind: input, shape index: {}]   ;;  %s650_s9 = inlined_call_operand.vmem [shape: f32[128,2], index: 9, kind: input, shape index: {}]   ;;  %s651_s10 = inlined_call_operand.vmem [shape: f32[1,2], index: 10, kind: input, shape index: {}]   ;;  %s652_s11 = inlined_call_operand.vmem [shape: f32[8,2], index: 11, kind: output, shape index: {}]  }
   0x1   :  { %s26_s19 = sshll.u32 %s643_s2, 4  ;;  %s27_s19 = int_to_ptr.hbm [resolvable:$true] %s26_s19 }
   0x2   :  { %17 = vsyncpa [#allocation5], 0  ;;  %s443_s20 = smov [#allocation2]   ;;  %s47_s24 = sshll.u32 %s648_s7, 4  ;;  %s48_s24 = int_to_ptr.hbm [resolvable:$true] %s47_s24 }
   0x3   :  { %s28_s21 = sshll.u32 %s443_s20, 4  ;;  %s444_s25 = smov 384   ;;  %s29_s21 = int_to_ptr.vmem [resolvable:$true] %s28_s21 }
   0x4   :  { %s445_s26 = smov 24   ;;  %s446_s27 = smov [#allocation4]  }
   0x5   :  { %34 = dma.hbm_to_vmem [thread:$0]  %s27_s19, 768, %s29_s21, [#allocation3], %s444_s25, %s444_s25, %s445_s26  }
   0x6   :  { %s49_s28 = sshll.u32 %s446_s27, 4  ;;  %s447_s29 = smov 128   ;;  %s50_s28 = int_to_ptr.vmem [resolvable:$true] %s49_s28 }
   0x7   :  { %s448_s30 = smov 8  }
   0x8   :  { %55 = dma.hbm_to_vmem [thread:$0]  %s48_s24, 2048, %s50_s28, [#allocation5], %s447_s29, %s447_s29, %s448_s30  }
   0x9   :  { %439 = dma.done.wait [#allocation3], 768  }
   0xa   :  { %440 = vsyncadd [#allocation3], 4294966528 }
   0xb   :  { %441 = dma.done.wait [#allocation5], 2048  }
   0xc   :  { %442 = vsyncadd [#allocation5], 4294965248  ;;  %v449_v0 = vmov 0   ;;  %v450_v1 = vmov 1   ;;  %vm89_vm0 = vcmask 1041408   ;;  %v70_v2 = vld [vmem:[%s642_s1] sm:$0xff]  ;;  %v71_v9 = vlaneseq }
   0xd   :  { %372 = vset.pattern.permute.xlu0 %v449_v0  ;;  %373 = vset.pattern.permute.xlu1 %v450_v1  ;;  %v159_v3 = vld [vmem:[%s641_s0] sm:$0xff]  ;;  %v79_v5 = vld [vmem:[#allocation2] sm:$0xff]  ;;  %v80_v7 = vld [vmem:[#allocation2 + $0x8] sm:$0xff]  ;;  %vm85_vm1 = vcmask 80896   ;;  %v451_v13 = vmov 0.0   ;;  %vm348_vm6 = vcmask 15360  }
   0xe   :  { %v82_v4 = vld [vmem:[#allocation2 + $0x18] sm:$0x3]  ;;  %74 = vperm.xlu0 %372, %v70_v2   ;;  %169 = vperm.xlu1 %373, %v159_v3   ;;  %v83_v6 = vld [vmem:[#allocation2 + $0x20] sm:$0x3]  ;;  %v211_v8 = vld [vmem:[%s646_s5 + $0x78] sm:$0xff]  ;;  %v72_v10 = vand.u32 127, %v71_v9 }
   0xf   :  { %357 = vmatpush.msk.msra.mxu2 %vm89_vm0, %v82_v4  ;;  %216 = vmatpush.msra.mxu3 %v211_v8  ;;  %v84_v12 = vld [vmem:[#allocation2 + $0x28] sm:$0x3]  ;;  %v81_v15 = vld [vmem:[#allocation2 + $0x10] sm:$0xff]  ;;  %v209_v17 = vld [vmem:[%s646_s5 + $0x68] sm:$0xff] }
  0x10   :  { %v210_v16 = vld [vmem:[%s646_s5 + $0x70] sm:$0xff]  ;;  %v208_v18 = vld [vmem:[%s646_s5 + $0x60] sm:$0xff]  ;;  %v207_v19 = vld [vmem:[%s646_s5 + $0x58] sm:$0xff] }
  0x11   :  { %114 = vmatpush.msra.mxu2 %v79_v5  ;;  %217 = vmatpush.msra.mxu3 %v210_v16  ;;  %v206_v20 = vld [vmem:[%s646_s5 + $0x50] sm:$0xff]  ;;  %v205_v21 = vld [vmem:[%s646_s5 + $0x48] sm:$0xff]  ;;  %v204_v22 = vld [vmem:[%s646_s5 + $0x40] sm:$0xff] }
  0x12   :  { %v203_v23 = vld [vmem:[%s646_s5 + $0x38] sm:$0xff]  ;;  %v160_v24 = vld [vmem:[%s644_s3] sm:$0x3]  ;;  %v202_v25 = vld [vmem:[%s646_s5 + $0x30] sm:$0xff] }
  0x13   :  { %359 = vmatpush.msk.msrb.mxu2 %vm89_vm0, %v83_v6  ;;  %218 = vmatpush.msra.mxu3 %v209_v17  ;;  %v201_v26 = vld [vmem:[%s646_s5 + $0x28] sm:$0xff]  ;;  %v200_v27 = vld [vmem:[%s646_s5 + $0x20] sm:$0xff]  ;;  %v172_v28 = vperm.slane %v160_v24, 1  ;;  %v166_v29 = vperm.slane %v160_v24, 0  ;;  %v199_v32 = vld [vmem:[%s646_s5 + $0x18] sm:$0xff] }
  0x14   :  { %v198_v33 = vld [vmem:[%s646_s5 + $0x10] sm:$0xff]  ;;  %v197_v36 = vld [vmem:[%s646_s5 + $0x8] sm:$0xff]  ;;  %v196_v37 = vld [vmem:[%s646_s5] sm:$0xff] }
  0x15   :  { %134 = vmatpush.msrb.mxu2 %v80_v7  ;;  %219 = vmatpush.msra.mxu3 %v208_v18  ;;  %v375_v39 = vld [vmem:[%s645_s4] ss:$0 sm:$0xff]  ;;  %v267_v57 = vld [vmem:[#allocation4 + $0x78] sm:$0xff]  ;;  %v266_v58 = vld [vmem:[#allocation4 + $0x70] sm:$0xff] }
  0x16   :  { %163 = vperm.xlu0 %372, %v159_v3   ;;  %272 = vmatpush.msra.mxu0 %v267_v57  ;;  %v265_v59 = vld [vmem:[#allocation4 + $0x68] sm:$0xff]  ;;  %v264_v60 = vld [vmem:[#allocation4 + $0x60] sm:$0xff]  ;;  %v263_v61 = vld [vmem:[#allocation4 + $0x58] sm:$0xff] }
  0x17   :  { %220 = vmatpush.msra.mxu3 %v207_v19  ;;  %v262_v62 = vld [vmem:[#allocation4 + $0x50] sm:$0xff]  ;;  %v261_v63 = vld [vmem:[#allocation4 + $0x48] sm:$0xff]  ;;  %v260_v0 = vld [vmem:[#allocation4 + $0x40] sm:$0xff] }
  0x18   :  { %273 = vmatpush.msra.mxu0 %v266_v58  ;;  %v258_v2 = vld [vmem:[#allocation4 + $0x30] sm:$0xff]  ;;  %v257_v3 = vld [vmem:[#allocation4 + $0x28] sm:$0xff]  ;;  %v256_v4 = vld [vmem:[#allocation4 + $0x20] sm:$0xff] }
  0x19   :  { %221 = vmatpush.msra.mxu3 %v206_v20  ;;  %v255_v5 = vld [vmem:[#allocation4 + $0x18] sm:$0xff]  ;;  %v254_v6 = vld [vmem:[#allocation4 + $0x10] sm:$0xff]  ;;  %v253_v7 = vld [vmem:[#allocation4 + $0x8] sm:$0xff] }
  0x1a   :  { %274 = vmatpush.msra.mxu0 %v265_v59  ;;  %v252_v8 = vld [vmem:[#allocation4] sm:$0xff]  ;;  %v376_v9 = vld [vmem:[%s647_s6] ss:$0 sm:$0xff] }
  0x1b   :  { %222 = vmatpush.msra.mxu3 %v205_v21 }
  0x1c   :  { %275 = vmatpush.msra.mxu0 %v264_v60 }
  0x1d   :  { %223 = vmatpush.msra.mxu3 %v204_v22 }
  0x1e   :  { %374 = vset.pattern.permute.xlu0 %v450_v1  ;;  %276 = vmatpush.msra.mxu0 %v263_v61  ;;  %v259_v1 = vld [vmem:[#allocation4 + $0x38] sm:$0xff] }
  0x1f   :  { %224 = vmatpush.msra.mxu3 %v203_v23 }
  0x20   :  { %277 = vmatpush.msra.mxu0 %v262_v62 }
  0x21   :  { %225 = vmatpush.msra.mxu3 %v202_v25 }
  0x22   :  { %278 = vmatpush.msra.mxu0 %v261_v63  ;;  %v378_v63 = vld [vmem:[%s651_s10] ss:$0 sm:$0xff] }
  0x23   :  { %226 = vmatpush.msra.mxu3 %v201_v26 }
  0x24   :  { %279 = vmatpush.msra.mxu0 %v260_v0 }
  0x25   :  { %227 = vmatpush.msra.mxu3 %v200_v27 }
  0x26   :  { %280 = vmatpush.msra.mxu0 %v259_v1 }
  0x27   :  { %228 = vmatpush.msra.mxu3 %v199_v32  ;;  %v319_v32 = vld [vmem:[%s650_s9 + $0x58] sm:$0xff] }
  0x28   :  { %281 = vmatpush.msra.mxu0 %v258_v2 }
  0x29   :  { %229 = vmatpush.msra.mxu3 %v198_v33  ;;  %v318_v33 = vld [vmem:[%s650_s9 + $0x50] sm:$0xff] }
  0x2a   :  { %282 = vmatpush.msra.mxu0 %v257_v3 }
  0x2b   :  { %230 = vmatpush.msra.mxu3 %v197_v36  ;;  %v315_v36 = vld [vmem:[%s650_s9 + $0x38] sm:$0xff] }
  0x2c   :  { %283 = vmatpush.msra.mxu0 %v256_v4 }
  0x2d   :  { %231 = vmatpush.msra.mxu3 %v196_v37  ;;  %v314_v37 = vld [vmem:[%s650_s9 + $0x30] sm:$0xff] }
  0x2e   :  { %284 = vmatpush.msra.mxu0 %v255_v5 }
  0x30   :  { %285 = vmatpush.msra.mxu0 %v254_v6 }
  0x32   :  { %286 = vmatpush.msra.mxu0 %v253_v7 }
  0x34   :  { %287 = vmatpush.msra.mxu0 %v252_v8 }
  0x80   :  { %v75_v11 = vpop.permute.xlu0 %74  ;;  %v170_v30 = vpop.permute.xlu1 %169 }
  0x81   :  { %vm76_vm2 = vcmp.eq.s32.totalorder %v72_v10, %v75_v11  ;;  %v173_v34 = vmul.f32 %v172_v28, %v170_v30  ;;  %v323_v28 = vld [vmem:[%s650_s9 + $0x78] sm:$0xff]  ;;  %v321_v30 = vld [vmem:[%s650_s9 + $0x68] sm:$0xff] }
  0x82   :  { %v356_v14 = vsel %vm76_vm2, 1.0, %v451_v13  ;;  %328 = vmatpush.msra.mxu1 %v323_v28 }
  0x83   :  { %358 = vmatmul.msk.f32.vlgmr.msra.gmra.mxu2 %vm85_vm1, %v356_v14 }
  0x84   :  { %361 = vmatpush.msk.msra.mxu2 %vm89_vm0, %v84_v12 }
  0x86   :  { %154 = vmatpush.msra.mxu2 %v81_v15 }
  0x88   :  { %v164_v31 = vpop.permute.xlu0 %163 }
  0x89   :  { %v167_v35 = vmul.f32 %v166_v29, %v164_v31  ;;  %v322_v29 = vld [vmem:[%s650_s9 + $0x70] sm:$0xff]  ;;  %v320_v31 = vld [vmem:[%s650_s9 + $0x60] sm:$0xff] }
  0x8a   :  { %329 = vmatpush.msra.mxu1 %v322_v29 }
  0x8b   :  { %360 = vmatmul.msk.f32.vlgmr.msrb.gmra.mxu2 %vm85_vm1, %v356_v14  ;;  %v174_v38 = vadd.f32 %v173_v34, %v167_v35  ;;  %v317_v34 = vld [vmem:[%s650_s9 + $0x48] sm:$0xff]  ;;  %v316_v35 = vld [vmem:[%s650_s9 + $0x40] sm:$0xff] }
  0x8c   :  { %330 = vmatpush.msra.mxu1 %v321_v30 }
  0x8d   :  { %v179_v40 = vadd.f32 %v375_v39, %v174_v38  ;;  %v313_v38 = vld [vmem:[%s650_s9 + $0x28] sm:$0xff]  ;;  %v312_v39 = vld [vmem:[%s650_s9 + $0x20] sm:$0xff] }
  0x8e   :  { %331 = vmatpush.msra.mxu1 %v320_v31 }
  0x90   :  { %332 = vmatpush.msra.mxu1 %v319_v32 }
  0x92   :  { %333 = vmatpush.msra.mxu1 %v318_v33 }
  0x93   :  { %362 = vmatmul.msk.f32.vlgmr.msra.gmra.mxu2 %vm85_vm1, %v356_v14 }
  0x94   :  { %334 = vmatpush.msra.mxu1 %v317_v34 }
  0x96   :  { %335 = vmatpush.msra.mxu1 %v316_v35 }
  0x98   :  { %336 = vmatpush.msra.mxu1 %v315_v36 }
  0x9a   :  { %337 = vmatpush.msra.mxu1 %v314_v37 }
  0x9c   :  { %338 = vmatpush.msra.mxu1 %v313_v38 }
  0x9e   :  { %339 = vmatpush.msra.mxu1 %v312_v39 }
 0x106   :  { %v116_v41 = vpop.f32.mrf.mxu2 }
 0x107   :  { %v180_v42 = vmul.f32 %v179_v40, %v116_v41  ;;  %v311_v40 = vld [vmem:[%s650_s9 + $0x18] sm:$0xff]  ;;  %v310_v41 = vld [vmem:[%s650_s9 + $0x10] sm:$0xff] }
 0x108   :  { %340 = vmatpush.msra.mxu1 %v311_v40 }
 0x109   :  { %v182_v43 = vand.u32 2147483647, %v180_v42  ;;  %v181_v54 = vmax.f32 %v180_v42, 0.0  ;;  %v309_v42 = vld [vmem:[%s650_s9 + $0x8] sm:$0xff] }
 0x10a   :  { %341 = vmatpush.msra.mxu1 %v310_v41 }
 0x10b   :  { %v183_v44 = vsub.f32 0.0, %v182_v43  ;;  %v308_v43 = vld [vmem:[%s650_s9] sm:$0xff] }
 0x10c   :  { %342 = vmatpush.msra.mxu1 %v309_v42 }
 0x10d   :  { %v184_v45 = vmul.f32 1.442695, %v183_v44  ;;  %v377_v44 = vld [vmem:[%s649_s8] ss:$0 sm:$0xff] }
 0x10e   :  { %v136_v12 = vpop.f32.mrf.mxu2  ;;  %343 = vmatpush.msra.mxu1 %v308_v43 }
 0x10f   :  { %379 = vpow2.f32 %v184_v45 }
 0x115   :  { %v380_v46 = vpop.eup %379 }
 0x116   :  { %v186_v47 = vadd.f32 1.0, %v380_v46  ;;  %v189_v48 = vmul.f32 -0.5, %v380_v46  ;;  %v192_v50 = vand.u32 2147483647, %v380_v46 }
 0x118   :  { %381 = vlog2.f32 %v186_v47  ;;  %v190_v49 = vadd.f32 1.0, %v189_v48  ;;  %vm193_vm3 = vcmp.lt.f32.partialorder %v192_v50, 0.0004427343  ;;  %v156_v47 = vpop.f32.mrf.mxu2 }
 0x11a   :  { %v191_v53 = vmul.f32 %v380_v46, %v190_v49 }
 0x11e   :  { %v382_v51 = vpop.eup %381 }
 0x11f   :  { %v188_v52 = vmul.f32 0.6931472, %v382_v51 }
 0x121   :  { %v194_v55 = vsel %vm193_vm3, %v191_v53, %v188_v52 }
 0x122   :  { %v195_v56 = vadd.f32 %v194_v55, %v181_v54 }
 0x124   :  { %232 = vmatmul.f32.vlgmr.msra.gmra.mxu3 %v195_v56 }
 0x1a7   :  { %v233_v10 = vpop.f32.mrf.mxu3 }
 0x1a8   :  { %v234_v11 = vadd.f32 %v376_v9, %v233_v10 }
 0x1aa   :  { %v236_v13 = vmul.f32 %v234_v11, %v136_v12 }
 0x1ac   :  { %v238_v14 = vand.u32 2147483647, %v236_v13  ;;  %v237_v25 = vmax.f32 %v236_v13, 0.0 }
 0x1ae   :  { %v239_v15 = vsub.f32 0.0, %v238_v14 }
 0x1b0   :  { %v240_v16 = vmul.f32 1.442695, %v239_v15 }
 0x1b2   :  { %383 = vpow2.f32 %v240_v16 }
 0x1b8   :  { %v384_v17 = vpop.eup %383 }
 0x1b9   :  { %v242_v18 = vadd.f32 1.0, %v384_v17  ;;  %v245_v19 = vmul.f32 -0.5, %v384_v17  ;;  %v248_v21 = vand.u32 2147483647, %v384_v17 }
 0x1bb   :  { %385 = vlog2.f32 %v242_v18  ;;  %v246_v20 = vadd.f32 1.0, %v245_v19  ;;  %vm249_vm4 = vcmp.lt.f32.partialorder %v248_v21, 0.0004427343 }
 0x1bd   :  { %v247_v24 = vmul.f32 %v384_v17, %v246_v20 }
 0x1c1   :  { %v386_v22 = vpop.eup %385 }
 0x1c2   :  { %v244_v23 = vmul.f32 0.6931472, %v386_v22 }
 0x1c4   :  { %v250_v26 = vsel %vm249_vm4, %v247_v24, %v244_v23 }
 0x1c5   :  { %v251_v27 = vadd.f32 %v250_v26, %v237_v25 }
 0x1c7   :  { %288 = vmatmul.f32.vlgmr.msra.gmra.mxu0 %v251_v27 }
 0x244   :  { %v289_v45 = vpop.f32.mrf.mxu0 }
 0x245   :  { %v290_v46 = vadd.f32 %v377_v44, %v289_v45 }
 0x247   :  { %v292_v48 = vmul.f32 %v290_v46, %v156_v47 }
 0x249   :  { %v294_v49 = vand.u32 2147483647, %v292_v48  ;;  %v293_v60 = vmax.f32 %v292_v48, 0.0 }
 0x24b   :  { %v295_v50 = vsub.f32 0.0, %v294_v49 }
 0x24d   :  { %v296_v51 = vmul.f32 1.442695, %v295_v50 }
 0x24f   :  { %387 = vpow2.f32 %v296_v51 }
 0x255   :  { %v388_v52 = vpop.eup %387 }
 0x256   :  { %v298_v53 = vadd.f32 1.0, %v388_v52  ;;  %v301_v54 = vmul.f32 -0.5, %v388_v52  ;;  %v304_v56 = vand.u32 2147483647, %v388_v52 }
 0x258   :  { %389 = vlog2.f32 %v298_v53  ;;  %v302_v55 = vadd.f32 1.0, %v301_v54  ;;  %vm305_vm5 = vcmp.lt.f32.partialorder %v304_v56, 0.0004427343 }
 0x25a   :  { %v303_v59 = vmul.f32 %v388_v52, %v302_v55 }
 0x25e   :  { %v390_v57 = vpop.eup %389 }
 0x25f   :  { %v300_v58 = vmul.f32 0.6931472, %v390_v57 }
 0x261   :  { %v306_v61 = vsel %vm305_vm5, %v303_v59, %v300_v58 }
 0x262   :  { %v307_v62 = vadd.f32 %v306_v61, %v293_v60 }
 0x264   :  { %344 = vmatmul.f32.vlgmr.msra.gmra.mxu1 %v307_v62 }
 0x2e1   :  { %v345_v0 = vpop.f32.mrf.mxu1 }
 0x2e2   :  { %v346_v1 = vadd.f32 %v378_v63, %v345_v0 }
 0x2e4   :  { %349 = vst.msk [vmem:[%s652_s11] sm:$0xff] %vm348_vm6, %v346_v1 }
 0x2e5   :  { %354 = vsyncpa [#allocation3], 1 }
 0x2e6   :  { %355 = vsyncpa [#allocation5], 1 }

</bundles_post_ra>
